<compile_context>
chip_gen: v7x
topology: tpu7x:2x2x1
jax: 0.10.0
libtpu: 0.0.40
codegen_flags: <defaults>
</compile_context>

<pallas_src>
import functools

import jax
import jax.numpy as jnp
from jax import lax
from jax.experimental import pallas as pl
from jax.experimental.pallas import tpu as pltpu


_TOKENS_PER_TILE = 256      # tokens per grid step (multiple of 8)
_N_INFLIGHT_ROWS = 16       # concurrent row DMAs in the HBM-gather path (power of two)
_ONEHOT_MAX_V = 1024        # vocab bound for the one-hot (MXU) resident gather
_DEFAULT_VMEM_BUDGET = 40 * (1 << 20)


def _vmem_budget_bytes() -> int:
    """Conservative VMEM budget for keeping the table resident (v7x has only 64 MiB)."""
    try:
        return int(0.75 * pltpu.get_tpu_info().vmem_capacity_bytes)
    except Exception:
        return _DEFAULT_VMEM_BUDGET


def _mosaic_params(vmem_needed_bytes: int) -> pltpu.CompilerParams:
    kwargs = dict(dimension_semantics=("parallel",))     # token tiles are independent
    if vmem_needed_bytes > 12 * (1 << 20):               # v5e default scoped VMEM is 16 MiB
        kwargs["vmem_limit_bytes"] = int(vmem_needed_bytes + (4 << 20))
    return pltpu.CompilerParams(**kwargs)


# --------------------------------------------------------------------------------------
# Path A: table resident in VMEM, gather = one-hot matmul on the MXU.
# --------------------------------------------------------------------------------------
def _resident_gather_kernel(ids_ref, table_ref, out_ref):
    # ids_ref:   (T, 1)  int32 token ids for this tile
    # table_ref: (V, D)  full embedding table, VMEM-resident (constant index_map)
    # out_ref:   (T, D)  dense output tile
    T = out_ref.shape[0]
    V = table_ref.shape[0]
    ids = ids_ref[...]                                            # (T, 1)
    vocab_iota = lax.broadcasted_iota(jnp.int32, (T, V), 1)       # (T, V)
    onehot = (vocab_iota == ids).astype(table_ref.dtype)          # (T, V), one 1.0 per row
    acc = jnp.dot(onehot, table_ref[...], preferred_element_type=jnp.float32)
    out_ref[...] = acc.astype(out_ref.dtype)


# --------------------------------------------------------------------------------------
# Path B: table stays in HBM; per tile, keep N row DMAs in flight into VMEM scratch.
# --------------------------------------------------------------------------------------
def _hbm_dma_gather_kernel(n_inflight, ids_smem, table_hbm, out_ref, row_buf, copy_sems):
    # ids_smem:  (n_tok_pad,) int32, scalar-prefetched into SMEM
    # table_hbm: (V, D) embedding table left in HBM (memory_space=pl.ANY)
    # out_ref:   (T, D) output tile (VMEM)
    # row_buf:   (T, D) VMEM scratch the row DMAs land in
    # copy_sems: (n_inflight,) DMA semaphores
    T = out_ref.shape[0]
    base = pl.program_id(0) * T
    slot_mask = n_inflight - 1                          # n_inflight is a power of two

    def start_row(i):
        row = ids_smem[base + i]
        pltpu.make_async_copy(table_hbm.at[pl.ds(row, 1), :],
                              row_buf.at[pl.ds(i, 1), :],
                              copy_sems.at[i & slot_mask]).start()

    def wait_row(i):
        # Same transfer shape and same semaphore slot as the copy issued by start_row(i).
        pltpu.make_async_copy(table_hbm.at[pl.ds(0, 1), :],
                              row_buf.at[pl.ds(i, 1), :],
                              copy_sems.at[i & slot_mask]).wait()

    # Prime the DMA pipeline with n_inflight row copies.
    lax.fori_loop(0, n_inflight, lambda i, c: (start_row(i), c)[1], 0)

    # Steady state: retire the oldest in-flight copy, issue the next one.
    def steady(i, c):
        wait_row(i - n_inflight)
        start_row(i)
        return c
    lax.fori_loop(n_inflight, T, steady, 0)

    # Drain the last n_inflight copies.
    lax.fori_loop(T - n_inflight, T, lambda i, c: (wait_row(i), c)[1], 0)

    out_ref[...] = row_buf[...]        # single dense (T, D) store


# --------------------------------------------------------------------------------------
# Wrapper
# --------------------------------------------------------------------------------------
@functools.partial(jax.jit, static_argnames=("tokens_per_tile", "force_dma_gather"))
def embedding_lookup_pallas(emb_table, input_ids, *, tokens_per_tile=_TOKENS_PER_TILE,
                            force_dma_gather=False):
    """token_embeddings = emb_table[input_ids], batched Pallas gather."""
    V, D = emb_table.shape
    T = int(tokens_per_tile)
    n_tok = 1
    for s in input_ids.shape:
        n_tok *= int(s)
    n_tiles = pl.cdiv(n_tok, T)
    n_pad = n_tiles * T
    esize = jnp.dtype(emb_table.dtype).itemsize

    # Clip (bounds safety) + pad to a whole number of tiles (id 0 is always valid).
    flat_ids = jnp.clip(input_ids.reshape(-1).astype(jnp.int32), 0, V - 1)
    flat_ids = jnp.pad(flat_ids, (0, n_pad - n_tok))

    out_tile_bytes = T * D * esize
    table_bytes = V * D * esize
    resident_vmem = table_bytes + 2 * out_tile_bytes + 2 * T * 4 + (1 << 20)
    use_resident = ((not force_dma_gather)
                    and V <= _ONEHOT_MAX_V
                    and resident_vmem <= _vmem_budget_bytes())

    if use_resident:
        ids_col = flat_ids.reshape(n_pad, 1)
        out_flat = pl.pallas_call(
            _resident_gather_kernel,
            out_shape=jax.ShapeDtypeStruct((n_pad, D), emb_table.dtype),
            grid=(n_tiles,),
            in_specs=[
                pl.BlockSpec((T, 1), lambda t: (t, 0)),          # ids tile
                pl.BlockSpec((V, D), lambda t: (0, 0)),          # whole table, loaded once
            ],
            out_specs=pl.BlockSpec((T, D), lambda t: (t, 0)),    # dense token tile
            compiler_params=_mosaic_params(resident_vmem),
        )(ids_col, emb_table)
    else:
        n_inflight = min(_N_INFLIGHT_ROWS, T)
        assert n_inflight & (n_inflight - 1) == 0, "n_inflight must be a power of two"
        dma_vmem = 3 * out_tile_bytes + (1 << 20)                # 2x out (pipeline) + scratch
        out_flat = pl.pallas_call(
            functools.partial(_hbm_dma_gather_kernel, n_inflight),
            out_shape=jax.ShapeDtypeStruct((n_pad, D), emb_table.dtype),
            grid_spec=pltpu.PrefetchScalarGridSpec(
                num_scalar_prefetch=1,                           # flat_ids -> SMEM
                grid=(n_tiles,),
                in_specs=[pl.BlockSpec(memory_space=pl.ANY)],    # table stays in HBM
                out_specs=pl.BlockSpec((T, D), lambda t, ids: (t, 0)),
                scratch_shapes=[
                    pltpu.VMEM((T, D), emb_table.dtype),
                    pltpu.SemaphoreType.DMA((n_inflight,)),
                ],
            ),
            compiler_params=_mosaic_params(dma_vmem),
        )(flat_ids, emb_table)

    return out_flat[:n_tok].reshape(*input_ids.shape, D)


class WordEmbeddingsPallas:
    """JAX/Pallas equivalent of the PyTorch WordEmbeddings forward pass."""

    def __init__(self, embedding_weights, update_embeddings: bool = False,
                 max_seq_length: int = 1000000):
        self.emb_weights = jnp.asarray(embedding_weights)
        self.embeddings_dimension = int(self.emb_weights.shape[1])
        self.update_embeddings = update_embeddings   # forward-only port
        self.max_seq_length = max_seq_length

    def get_word_embedding_dimension(self) -> int:
        return self.embeddings_dimension

    def forward(self, features: dict) -> dict:
        token_embeddings = embedding_lookup_pallas(self.emb_weights, features["input_ids"])
        features.update({
            "token_embeddings": token_embeddings,
            "cls_token_embeddings": None,
            "attention_mask": features["attention_mask"],
        })
        return features


if __name__ == "__main__":
    key = jax.random.PRNGKey(0)
    k_emb, k_ids = jax.random.split(key)

    # small synthetic shapes: vocab=32, embedding_dim=128, batch=2, seq=8
    V, D, B, S = 32, 128, 2, 8
    emb_weights = jax.random.normal(k_emb, (V, D), dtype=jnp.float32)
    input_ids = jax.random.randint(k_ids, (B, S), minval=0, maxval=V, dtype=jnp.int32)
    attention_mask = jnp.ones((B, S), dtype=jnp.int32)

    module = WordEmbeddingsPallas(emb_weights)
    features = {"input_ids": input_ids, "attention_mask": attention_mask}
    out = module.forward(features)
    tok_emb = jax.block_until_ready(out["token_embeddings"])

    ref = jnp.take(emb_weights, input_ids, axis=0)
    assert tok_emb.shape == (B, S, D)
    assert out["cls_token_embeddings"] is None
    assert jnp.allclose(tok_emb, ref, atol=1e-5, rtol=1e-5), "resident-table path mismatch"

    # Also exercise the large-table path (table left in HBM, manual row-DMA gather).
    tok_dma = jax.block_until_ready(
        embedding_lookup_pallas(emb_weights, input_ids, force_dma_gather=True))
    assert jnp.allclose(tok_dma, ref), "HBM DMA-gather path mismatch"

    print("KERNEL_OK")
</pallas_src>

<mosaic_0001>
module attributes {stable_mosaic.version = 11 : i64} {
  func.func @_resident_gather_kernel(%arg0: i32, %arg1: memref<256x1xi32, #tpu.memory_space<vmem>>, %arg2: memref<32x128xf32, #tpu.memory_space<vmem>>, %arg3: memref<256x128xf32, #tpu.memory_space<vmem>>) attributes {dimension_semantics = [#tpu.dimension_semantics<parallel>], iteration_bounds = array<i64: 1>, scalar_prefetch = 0 : i64, scratch_operands = 0 : i64, tpu.core_type = #tpu.core_type<tc>, window_params = [{transform_indices = @transform_0, window_bounds = array<i64: 256, 1>}, {pipeline_mode = #tpu.pipeline_mode<synchronous>, transform_indices = @transform_1, window_bounds = array<i64: 32, 128>}, {transform_indices = @transform_2, window_bounds = array<i64: 256, 128>}]} {
    %c0 = arith.constant 0 : index
    %c0_0 = arith.constant 0 : index
    %0 = vector.load %arg1[%c0, %c0_0] : memref<256x1xi32, #tpu.memory_space<vmem>>, vector<256x1xi32>
    %1 = tpu.iota {dimensions = array<i32: 1>} : vector<256x32xi32>
    %2 = vector.broadcast %0 : vector<256x1xi32> to vector<256x32xi32>
    %3 = arith.cmpi eq, %1, %2 : vector<256x32xi32>
    %4 = arith.extui %3 : vector<256x32xi1> to vector<256x32xi32>
    %5 = arith.sitofp %4 : vector<256x32xi32> to vector<256x32xf32>
    %c0_1 = arith.constant 0 : index
    %c0_2 = arith.constant 0 : index
    %6 = vector.load %arg2[%c0_1, %c0_2] : memref<32x128xf32, #tpu.memory_space<vmem>>, vector<32x128xf32>
    %cst = arith.constant dense<0.000000e+00> : vector<256x128xf32>
    %7 = tpu.matmul %5, %6, %cst {dimension_numbers = #tpu.dot_dimension_numbers<[1], [0], [0], [1], [0, 0, 1, 1], [], []>} : vector<256x32xf32>, vector<32x128xf32>, vector<256x128xf32> -> vector<256x128xf32>
    %c0_3 = arith.constant 0 : index
    %c0_4 = arith.constant 0 : index
    %8 = vector.load %arg3[%c0_3, %c0_4] : memref<256x128xf32, #tpu.memory_space<vmem>>, vector<256x128xf32>
    tpu.vector_store %arg3[%c0_3, %c0_4], %7 {strides = array<i32>} : memref<256x128xf32, #tpu.memory_space<vmem>>, vector<256x128xf32>,
    return
  }
  func.func @transform_0(%arg0: i32) -> (i32, i32) {
    %c0_i32 = arith.constant 0 : i32
    %c0_i32_0 = arith.constant 0 : i32
    return %arg0, %c0_i32 : i32, i32
  }
  func.func @transform_1(%arg0: i32) -> (i32, i32) {
    %c0_i32 = arith.constant 0 : i32
    %c0_i32_0 = arith.constant 0 : i32
    %c0_i32_1 = arith.constant 0 : i32
    return %c0_i32, %c0_i32_0 : i32, i32
  }
  func.func @transform_2(%arg0: i32) -> (i32, i32) {
    %c0_i32 = arith.constant 0 : i32
    %c0_i32_0 = arith.constant 0 : i32
    return %arg0, %c0_i32 : i32, i32
  }
}

</mosaic_0001>

<bundles_post_ra>
// kernel: embedding_lookup_pallas.1
= control target key start
LH: loop header
LB: loop body
LE: loop exit
PB: predicated region body
PF: predicated region fallthrough
CT: control target
= control target key end

     0   :  { %v771_v0 = vmov 0   ;;  %v43_v39 = vlaneseq  ;;  %vm241_vm0 = vcmask 261120   ;;  %v772_v43 = vmov 0.0   ;;  %s1090_s0 = inlined_call_operand.vmem [shape: s32[256,1], index: 0, kind: input, shape index: {}]   ;;  %s1091_s1 = inlined_call_operand.vmem [shape: f32[32,128], index: 1, kind: input, shape index: {}]   ;;  %s1092_s2 = inlined_call_operand.vmem [shape: f32[256,128], index: 2, kind: output, shape index: {}]  }
   0x1   :  { %770 = vset.pattern.permute.xlu1 %v771_v0  ;;  %769 = vset.pattern.permute.xlu0 %v771_v0  ;;  %v12_v1 = vld [vmem:[%s1090_s0 + $0x8] sm:$0xff]  ;;  %v11_v2 = vld [vmem:[%s1090_s0] sm:$0xff]  ;;  %v29_v5 = vld [vmem:[%s1090_s0 + $0x90] sm:$0xff] }
   0x2   :  { %49 = vperm.xlu1 %770, %v12_v1   ;;  %46 = vperm.xlu0 %769, %v11_v2   ;;  %v28_v3 = vld [vmem:[%s1090_s0 + $0x88] sm:$0xff]  ;;  %v27_v4 = vld [vmem:[%s1090_s0 + $0x80] sm:$0xff]  ;;  %v13_v6 = vld [vmem:[%s1090_s0 + $0x10] sm:$0xff]  ;;  %v896_v40 = vand.u32 127, %v43_v39 }
   0x3   :  { %v30_v7 = vld [vmem:[%s1090_s0 + $0x98] sm:$0xff]  ;;  %v237_v9 = vld [vmem:[%s1091_s1] sm:$0xff]  ;;  %v238_v10 = vld [vmem:[%s1091_s1 + $0x8] sm:$0xff] }
   0x4   :  { %v14_v8 = vld [vmem:[%s1090_s0 + $0x18] sm:$0xff]  ;;  %v239_v11 = vld [vmem:[%s1091_s1 + $0x10] sm:$0xff]  ;;  %v755_v13 = vpack.c.bf16 %v238_v10, %v237_v9  ;;  %v31_v15 = vld [vmem:[%s1090_s0 + $0xa0] sm:$0xff] }
   0x5   :  { %v240_v12 = vld [vmem:[%s1091_s1 + $0x18] sm:$0xff]  ;;  %v15_v16 = vld [vmem:[%s1090_s0 + $0x20] sm:$0xff]  ;;  %v32_v17 = vld [vmem:[%s1090_s0 + $0xa8] sm:$0xff] }
   0x6   :  { %97 = vperm.xlu1 %770, %v28_v3   ;;  %94 = vperm.xlu0 %769, %v27_v4   ;;  %v759_v14 = vpack.c.bf16 %v240_v12, %v239_v11  ;;  %v16_v18 = vld [vmem:[%s1090_s0 + $0x28] sm:$0xff]  ;;  %v33_v19 = vld [vmem:[%s1090_s0 + $0xb0] sm:$0xff]  ;;  %v34_v21 = vld [vmem:[%s1090_s0 + $0xb8] sm:$0xff] }
   0x7   :  { %756 = vmatprep.subr.bf16.mxu0 %v755_v13  ;;  %763 = vmatprep.subr.bf16.mxu1 %v755_v13  ;;  %v17_v20 = vld [vmem:[%s1090_s0 + $0x30] sm:$0xff]  ;;  %v18_v22 = vld [vmem:[%s1090_s0 + $0x38] sm:$0xff]  ;;  %v35_v23 = vld [vmem:[%s1090_s0 + $0xc0] sm:$0xff] }
   0x8   :  { %758 = vmatpush3.bf16.msra.mxu0 %v755_v13  ;;  %765 = vmatpush3.bf16.msra.mxu1 %v755_v13  ;;  %v19_v24 = vld [vmem:[%s1090_s0 + $0x40] sm:$0xff]  ;;  %v36_v25 = vld [vmem:[%s1090_s0 + $0xc8] sm:$0xff]  ;;  %v37_v27 = vld [vmem:[%s1090_s0 + $0xd0] sm:$0xff] }
   0x9   :  { %760 = vmatprep.subr.bf16.mxu0 %v759_v14  ;;  %764 = vmatprep.subr.bf16.mxu1 %v759_v14  ;;  %v20_v26 = vld [vmem:[%s1090_s0 + $0x48] sm:$0xff]  ;;  %v21_v28 = vld [vmem:[%s1090_s0 + $0x50] sm:$0xff]  ;;  %v38_v29 = vld [vmem:[%s1090_s0 + $0xd8] sm:$0xff] }
   0xa   :  { %100 = vperm.xlu1 %770, %v29_v5   ;;  %52 = vperm.xlu0 %769, %v13_v6   ;;  %v22_v30 = vld [vmem:[%s1090_s0 + $0x58] sm:$0xff]  ;;  %v39_v31 = vld [vmem:[%s1090_s0 + $0xe0] sm:$0xff]  ;;  %v40_v33 = vld [vmem:[%s1090_s0 + $0xe8] sm:$0xff] }
   0xb   :  { %v23_v32 = vld [vmem:[%s1090_s0 + $0x60] sm:$0xff]  ;;  %v24_v34 = vld [vmem:[%s1090_s0 + $0x68] sm:$0xff]  ;;  %v41_v35 = vld [vmem:[%s1090_s0 + $0xf0] sm:$0xff] }
   0xc   :  { %762 = vmatpush3.bf16.msra.mxu0 %v759_v14  ;;  %766 = vmatpush3.bf16.msra.mxu1 %v759_v14  ;;  %v25_v36 = vld [vmem:[%s1090_s0 + $0x70] sm:$0xff]  ;;  %v42_v37 = vld [vmem:[%s1090_s0 + $0xf8] sm:$0xff] }
   0xd   :  { %v26_v38 = vld [vmem:[%s1090_s0 + $0x78] sm:$0xff] }
   0xe   :  { %103 = vperm.xlu1 %770, %v30_v7   ;;  %55 = vperm.xlu0 %769, %v14_v8  }
  0x12   :  { %106 = vperm.xlu1 %770, %v31_v15   ;;  %58 = vperm.xlu0 %769, %v15_v16  }
  0x16   :  { %109 = vperm.xlu1 %770, %v32_v17   ;;  %61 = vperm.xlu0 %769, %v16_v18  }
  0x1a   :  { %112 = vperm.xlu1 %770, %v33_v19   ;;  %64 = vperm.xlu0 %769, %v17_v20  }
  0x1e   :  { %115 = vperm.xlu1 %770, %v34_v21   ;;  %67 = vperm.xlu0 %769, %v18_v22  }
  0x22   :  { %118 = vperm.xlu1 %770, %v35_v23   ;;  %70 = vperm.xlu0 %769, %v19_v24  }
  0x26   :  { %121 = vperm.xlu1 %770, %v36_v25   ;;  %73 = vperm.xlu0 %769, %v20_v26  }
  0x2a   :  { %124 = vperm.xlu1 %770, %v37_v27   ;;  %76 = vperm.xlu0 %769, %v21_v28  }
  0x2e   :  { %127 = vperm.xlu1 %770, %v38_v29   ;;  %79 = vperm.xlu0 %769, %v22_v30  }
  0x32   :  { %130 = vperm.xlu1 %770, %v39_v31   ;;  %82 = vperm.xlu0 %769, %v23_v32  }
  0x36   :  { %133 = vperm.xlu1 %770, %v40_v33   ;;  %85 = vperm.xlu0 %769, %v24_v34  }
  0x3a   :  { %136 = vperm.xlu1 %770, %v41_v35   ;;  %88 = vperm.xlu0 %769, %v25_v36  }
  0x3e   :  { %139 = vperm.xlu1 %770, %v42_v37   ;;  %91 = vperm.xlu0 %769, %v26_v38  }
  0x81   :  { %v50_v41 = vpop.permute.xlu1 %49  ;;  %v47_v42 = vpop.permute.xlu0 %46 }
  0x82   :  { %vm142_vm1 = vcmp.eq.s32.totalorder %v896_v40, %v50_v41  ;;  %vm141_vm2 = vcmp.eq.s32.totalorder %v896_v40, %v47_v42 }
  0x83   :  { %v600_v44 = vsel %vm142_vm1, 1.0, %v772_v43  ;;  %v599_v45 = vsel %vm141_vm2, 1.0, %v772_v43 }
  0x84   :  { %707 = vmatprep.mubr.msk.f32.mxu0 %vm241_vm0, %v599_v45 }
  0x85   :  { %v98_v46 = vpop.permute.xlu1 %97  ;;  %708 = vmatmul.mubr.msk.f32.vlgmr.msra.gmra.mrb[0].mxu0 %vm241_vm0, %v600_v44  ;;  %v95_v47 = vpop.permute.xlu0 %94 }
  0x86   :  { %vm158_vm3 = vcmp.eq.s32.totalorder %v896_v40, %v98_v46  ;;  %vm157_vm4 = vcmp.eq.s32.totalorder %v896_v40, %v95_v47 }
  0x87   :  { %v616_v48 = vsel %vm158_vm3, 1.0, %v772_v43  ;;  %v615_v49 = vsel %vm157_vm4, 1.0, %v772_v43 }
  0x88   :  { %731 = vmatprep.mubr.msk.f32.mxu1 %vm241_vm0, %v615_v49 }
  0x89   :  { %v101_v50 = vpop.permute.xlu1 %100  ;;  %732 = vmatmul.mubr.msk.f32.vlgmr.msra.gmra.mrb[0].mxu1 %vm241_vm0, %v616_v48  ;;  %v53_v51 = vpop.permute.xlu0 %52 }
  0x8a   :  { %vm159_vm5 = vcmp.eq.s32.totalorder %v896_v40, %v101_v50  ;;  %vm143_vm6 = vcmp.eq.s32.totalorder %v896_v40, %v53_v51 }
  0x8b   :  { %v617_v52 = vsel %vm159_vm5, 1.0, %v772_v43  ;;  %v601_v53 = vsel %vm143_vm6, 1.0, %v772_v43 }
  0x8c   :  { %710 = vmatprep.mubr.msk.f32.mxu0 %vm241_vm0, %v601_v53  ;;  %734 = vmatprep.mubr.msk.f32.mxu1 %vm241_vm0, %v617_v52 }
  0x8d   :  { %v104_v54 = vpop.permute.xlu1 %103  ;;  %v56_v55 = vpop.permute.xlu0 %55 }
  0x8e   :  { %vm160_vm7 = vcmp.eq.s32.totalorder %v896_v40, %v104_v54  ;;  %vm144_vm8 = vcmp.eq.s32.totalorder %v896_v40, %v56_v55 }
  0x8f   :  { %v618_v56 = vsel %vm160_vm7, 1.0, %v772_v43  ;;  %v602_v57 = vsel %vm144_vm8, 1.0, %v772_v43 }
  0x90   :  { %711 = vmatmul.mubr.msk.f32.gmra.mrb[2].mxu0 %vm241_vm0, %v602_v57  ;;  %735 = vmatmul.mubr.msk.f32.gmra.mrb[2].mxu1 %vm241_vm0, %v618_v56 }
  0x91   :  { %v107_v58 = vpop.permute.xlu1 %106  ;;  %v59_v59 = vpop.permute.xlu0 %58 }
  0x92   :  { %vm161_vm9 = vcmp.eq.s32.totalorder %v896_v40, %v107_v58  ;;  %vm145_vm10 = vcmp.eq.s32.totalorder %v896_v40, %v59_v59 }
  0x93   :  { %v619_v60 = vsel %vm161_vm9, 1.0, %v772_v43  ;;  %v603_v61 = vsel %vm145_vm10, 1.0, %v772_v43 }
  0x94   :  { %713 = vmatprep.mubr.msk.f32.mxu0 %vm241_vm0, %v603_v61  ;;  %737 = vmatprep.mubr.msk.f32.mxu1 %vm241_vm0, %v619_v60 }
  0x95   :  { %v110_v62 = vpop.permute.xlu1 %109  ;;  %v62_v63 = vpop.permute.xlu0 %61 }
  0x96   :  { %vm162_vm11 = vcmp.eq.s32.totalorder %v896_v40, %v110_v62  ;;  %vm146_vm12 = vcmp.eq.s32.totalorder %v896_v40, %v62_v63 }
  0x97   :  { %v620_v0 = vsel %vm162_vm11, 1.0, %v772_v43  ;;  %v604_v1 = vsel %vm146_vm12, 1.0, %v772_v43 }
  0x98   :  { %714 = vmatmul.mubr.msk.f32.gmra.mrb[4].mxu0 %vm241_vm0, %v604_v1  ;;  %738 = vmatmul.mubr.msk.f32.gmra.mrb[4].mxu1 %vm241_vm0, %v620_v0 }
  0x99   :  { %v113_v2 = vpop.permute.xlu1 %112  ;;  %v65_v3 = vpop.permute.xlu0 %64 }
  0x9a   :  { %vm163_vm13 = vcmp.eq.s32.totalorder %v896_v40, %v113_v2  ;;  %vm147_vm14 = vcmp.eq.s32.totalorder %v896_v40, %v65_v3 }
  0x9b   :  { %v621_v4 = vsel %vm163_vm13, 1.0, %v772_v43  ;;  %v605_v5 = vsel %vm147_vm14, 1.0, %v772_v43 }
  0x9c   :  { %716 = vmatprep.mubr.msk.f32.mxu0 %vm241_vm0, %v605_v5  ;;  %740 = vmatprep.mubr.msk.f32.mxu1 %vm241_vm0, %v621_v4 }
  0x9d   :  { %v116_v6 = vpop.permute.xlu1 %115  ;;  %v68_v7 = vpop.permute.xlu0 %67 }
  0x9e   :  { %vm164_vm15 = vcmp.eq.s32.totalorder %v896_v40, %v116_v6  ;;  %vm148_vm1 = vcmp.eq.s32.totalorder %v896_v40, %v68_v7 }
  0x9f   :  { %v622_v8 = vsel %vm164_vm15, 1.0, %v772_v43  ;;  %v606_v9 = vsel %vm148_vm1, 1.0, %v772_v43 }
  0xa0   :  { %717 = vmatmul.mubr.msk.f32.gmra.mrb[6].mxu0 %vm241_vm0, %v606_v9  ;;  %741 = vmatmul.mubr.msk.f32.gmra.mrb[6].mxu1 %vm241_vm0, %v622_v8 }
  0xa1   :  { %v119_v10 = vpop.permute.xlu1 %118  ;;  %v71_v11 = vpop.permute.xlu0 %70 }
  0xa2   :  { %vm165_vm2 = vcmp.eq.s32.totalorder %v896_v40, %v119_v10  ;;  %vm149_vm3 = vcmp.eq.s32.totalorder %v896_v40, %v71_v11 }
  0xa3   :  { %v623_v12 = vsel %vm165_vm2, 1.0, %v772_v43  ;;  %v607_v13 = vsel %vm149_vm3, 1.0, %v772_v43 }
  0xa4   :  { %719 = vmatprep.mubr.msk.f32.mxu0 %vm241_vm0, %v607_v13  ;;  %743 = vmatprep.mubr.msk.f32.mxu1 %vm241_vm0, %v623_v12 }
  0xa5   :  { %v122_v14 = vpop.permute.xlu1 %121  ;;  %v74_v15 = vpop.permute.xlu0 %73 }
  0xa6   :  { %vm166_vm4 = vcmp.eq.s32.totalorder %v896_v40, %v122_v14  ;;  %vm150_vm5 = vcmp.eq.s32.totalorder %v896_v40, %v74_v15 }
  0xa7   :  { %v624_v16 = vsel %vm166_vm4, 1.0, %v772_v43  ;;  %v608_v17 = vsel %vm150_vm5, 1.0, %v772_v43 }
  0xa8   :  { %720 = vmatmul.mubr.msk.f32.gmra.mrb[8].mxu0 %vm241_vm0, %v608_v17  ;;  %744 = vmatmul.mubr.msk.f32.gmra.mrb[8].mxu1 %vm241_vm0, %v624_v16 }
  0xa9   :  { %v125_v18 = vpop.permute.xlu1 %124  ;;  %v77_v19 = vpop.permute.xlu0 %76 }
  0xaa   :  { %vm167_vm6 = vcmp.eq.s32.totalorder %v896_v40, %v125_v18  ;;  %vm151_vm7 = vcmp.eq.s32.totalorder %v896_v40, %v77_v19 }
  0xab   :  { %v625_v20 = vsel %vm167_vm6, 1.0, %v772_v43  ;;  %v609_v21 = vsel %vm151_vm7, 1.0, %v772_v43 }
  0xac   :  { %722 = vmatprep.mubr.msk.f32.mxu0 %vm241_vm0, %v609_v21  ;;  %746 = vmatprep.mubr.msk.f32.mxu1 %vm241_vm0, %v625_v20 }
  0xad   :  { %v128_v22 = vpop.permute.xlu1 %127  ;;  %v80_v23 = vpop.permute.xlu0 %79 }
  0xae   :  { %vm168_vm8 = vcmp.eq.s32.totalorder %v896_v40, %v128_v22  ;;  %vm152_vm9 = vcmp.eq.s32.totalorder %v896_v40, %v80_v23 }
  0xaf   :  { %v626_v24 = vsel %vm168_vm8, 1.0, %v772_v43  ;;  %v610_v25 = vsel %vm152_vm9, 1.0, %v772_v43 }
  0xb0   :  { %723 = vmatmul.mubr.msk.f32.gmra.mrb[10].mxu0 %vm241_vm0, %v610_v25  ;;  %747 = vmatmul.mubr.msk.f32.gmra.mrb[10].mxu1 %vm241_vm0, %v626_v24 }
  0xb1   :  { %v131_v26 = vpop.permute.xlu1 %130  ;;  %v83_v27 = vpop.permute.xlu0 %82 }
  0xb2   :  { %vm169_vm10 = vcmp.eq.s32.totalorder %v896_v40, %v131_v26  ;;  %vm153_vm11 = vcmp.eq.s32.totalorder %v896_v40, %v83_v27 }
  0xb3   :  { %v627_v28 = vsel %vm169_vm10, 1.0, %v772_v43  ;;  %v611_v29 = vsel %vm153_vm11, 1.0, %v772_v43 }
  0xb4   :  { %725 = vmatprep.mubr.msk.f32.mxu0 %vm241_vm0, %v611_v29  ;;  %749 = vmatprep.mubr.msk.f32.mxu1 %vm241_vm0, %v627_v28 }
  0xb5   :  { %v134_v30 = vpop.permute.xlu1 %133  ;;  %v86_v31 = vpop.permute.xlu0 %85 }
  0xb6   :  { %vm170_vm12 = vcmp.eq.s32.totalorder %v896_v40, %v134_v30  ;;  %vm154_vm13 = vcmp.eq.s32.totalorder %v896_v40, %v86_v31 }
  0xb7   :  { %v628_v32 = vsel %vm170_vm12, 1.0, %v772_v43  ;;  %v612_v33 = vsel %vm154_vm13, 1.0, %v772_v43 }
  0xb8   :  { %726 = vmatmul.mubr.msk.f32.gmra.mrb[12].mxu0 %vm241_vm0, %v612_v33  ;;  %750 = vmatmul.mubr.msk.f32.gmra.mrb[12].mxu1 %vm241_vm0, %v628_v32 }
  0xb9   :  { %v137_v34 = vpop.permute.xlu1 %136  ;;  %v89_v35 = vpop.permute.xlu0 %88 }
  0xba   :  { %vm171_vm14 = vcmp.eq.s32.totalorder %v896_v40, %v137_v34  ;;  %vm155_vm15 = vcmp.eq.s32.totalorder %v896_v40, %v89_v35 }
  0xbb   :  { %v629_v36 = vsel %vm171_vm14, 1.0, %v772_v43  ;;  %v613_v37 = vsel %vm155_vm15, 1.0, %v772_v43 }
  0xbc   :  { %728 = vmatprep.mubr.msk.f32.mxu0 %vm241_vm0, %v613_v37  ;;  %752 = vmatprep.mubr.msk.f32.mxu1 %vm241_vm0, %v629_v36 }
  0xbd   :  { %v140_v38 = vpop.permute.xlu1 %139  ;;  %v92_v39 = vpop.permute.xlu0 %91 }
  0xbe   :  { %vm172_vm1 = vcmp.eq.s32.totalorder %v896_v40, %v140_v38  ;;  %vm156_vm2 = vcmp.eq.s32.totalorder %v896_v40, %v92_v39 }
  0xbf   :  { %v630_v41 = vsel %vm172_vm1, 1.0, %v772_v43  ;;  %v614_v42 = vsel %vm156_vm2, 1.0, %v772_v43 }
  0xc0   :  { %729 = vmatmul.mubr.msk.f32.gmra.mrb[14].mxu0 %vm241_vm0, %v614_v42  ;;  %753 = vmatmul.mubr.msk.f32.gmra.mrb[14].mxu1 %vm241_vm0, %v630_v41 }
 0x158   :  { %v709_v44 = vpop.f32.mrb[0].mxu0 }
 0x159   :  { %564 = vst [vmem:[%s1092_s2 + $0x8] sm:$0xff] %v709_v44  ;;  %v404_v45 = vpop.f32.mrb[1].mxu0 }
 0x15a   :  { %563 = vst [vmem:[%s1092_s2] sm:$0xff] %v404_v45 }
 0x15c   :  { %v733_v46 = vpop.f32.mrb[0].mxu1 }
 0x15d   :  { %580 = vst [vmem:[%s1092_s2 + $0x88] sm:$0xff] %v733_v46  ;;  %v484_v40 = vpop.f32.mrb[1].mxu1 }
 0x15e   :  { %579 = vst [vmem:[%s1092_s2 + $0x80] sm:$0xff] %v484_v40 }
 0x163   :  { %v712_v43 = vpop.f32.mrb[2].mxu0  ;;  %v736_v47 = vpop.f32.mrb[2].mxu1 }
 0x164   :  { %566 = vst [vmem:[%s1092_s2 + $0x18] sm:$0xff] %v712_v43  ;;  %582 = vst [vmem:[%s1092_s2 + $0x98] sm:$0xff] %v736_v47  ;;  %v414_v48 = vpop.f32.mrb[3].mxu0  ;;  %v494_v49 = vpop.f32.mrb[3].mxu1 }
 0x165   :  { %565 = vst [vmem:[%s1092_s2 + $0x10] sm:$0xff] %v414_v48  ;;  %581 = vst [vmem:[%s1092_s2 + $0x90] sm:$0xff] %v494_v49 }
 0x16b   :  { %v715_v50 = vpop.f32.mrb[4].mxu0  ;;  %v739_v51 = vpop.f32.mrb[4].mxu1 }
 0x16c   :  { %568 = vst [vmem:[%s1092_s2 + $0x28] sm:$0xff] %v715_v50  ;;  %584 = vst [vmem:[%s1092_s2 + $0xa8] sm:$0xff] %v739_v51  ;;  %v424_v52 = vpop.f32.mrb[5].mxu0  ;;  %v504_v53 = vpop.f32.mrb[5].mxu1 }
 0x16d   :  { %567 = vst [vmem:[%s1092_s2 + $0x20] sm:$0xff] %v424_v52  ;;  %583 = vst [vmem:[%s1092_s2 + $0xa0] sm:$0xff] %v504_v53 }
 0x173   :  { %v718_v54 = vpop.f32.mrb[6].mxu0  ;;  %v742_v55 = vpop.f32.mrb[6].mxu1 }
 0x174   :  { %570 = vst [vmem:[%s1092_s2 + $0x38] sm:$0xff] %v718_v54  ;;  %586 = vst [vmem:[%s1092_s2 + $0xb8] sm:$0xff] %v742_v55  ;;  %v434_v56 = vpop.f32.mrb[7].mxu0  ;;  %v514_v57 = vpop.f32.mrb[7].mxu1 }
 0x175   :  { %569 = vst [vmem:[%s1092_s2 + $0x30] sm:$0xff] %v434_v56  ;;  %585 = vst [vmem:[%s1092_s2 + $0xb0] sm:$0xff] %v514_v57 }
 0x17b   :  { %v721_v58 = vpop.f32.mrb[8].mxu0  ;;  %v745_v59 = vpop.f32.mrb[8].mxu1 }
 0x17c   :  { %572 = vst [vmem:[%s1092_s2 + $0x48] sm:$0xff] %v721_v58  ;;  %588 = vst [vmem:[%s1092_s2 + $0xc8] sm:$0xff] %v745_v59  ;;  %v444_v60 = vpop.f32.mrb[9].mxu0  ;;  %v524_v61 = vpop.f32.mrb[9].mxu1 }
 0x17d   :  { %571 = vst [vmem:[%s1092_s2 + $0x40] sm:$0xff] %v444_v60  ;;  %587 = vst [vmem:[%s1092_s2 + $0xc0] sm:$0xff] %v524_v61 }
 0x183   :  { %v724_v62 = vpop.f32.mrb[10].mxu0  ;;  %v748_v63 = vpop.f32.mrb[10].mxu1 }
 0x184   :  { %574 = vst [vmem:[%s1092_s2 + $0x58] sm:$0xff] %v724_v62  ;;  %590 = vst [vmem:[%s1092_s2 + $0xd8] sm:$0xff] %v748_v63  ;;  %v454_v0 = vpop.f32.mrb[11].mxu0  ;;  %v534_v1 = vpop.f32.mrb[11].mxu1 }
 0x185   :  { %573 = vst [vmem:[%s1092_s2 + $0x50] sm:$0xff] %v454_v0  ;;  %589 = vst [vmem:[%s1092_s2 + $0xd0] sm:$0xff] %v534_v1 }
 0x18b   :  { %v727_v2 = vpop.f32.mrb[12].mxu0  ;;  %v751_v3 = vpop.f32.mrb[12].mxu1 }
 0x18c   :  { %576 = vst [vmem:[%s1092_s2 + $0x68] sm:$0xff] %v727_v2  ;;  %592 = vst [vmem:[%s1092_s2 + $0xe8] sm:$0xff] %v751_v3  ;;  %v464_v4 = vpop.f32.mrb[13].mxu0  ;;  %v544_v5 = vpop.f32.mrb[13].mxu1 }
 0x18d   :  { %575 = vst [vmem:[%s1092_s2 + $0x60] sm:$0xff] %v464_v4  ;;  %591 = vst [vmem:[%s1092_s2 + $0xe0] sm:$0xff] %v544_v5 }
 0x193   :  { %v730_v6 = vpop.f32.mrb[14].mxu0  ;;  %v754_v7 = vpop.f32.mrb[14].mxu1 }
 0x194   :  { %578 = vst [vmem:[%s1092_s2 + $0x78] sm:$0xff] %v730_v6  ;;  %594 = vst [vmem:[%s1092_s2 + $0xf8] sm:$0xff] %v754_v7  ;;  %v474_v8 = vpop.f32.mrb[15].mxu0  ;;  %v554_v9 = vpop.f32.mrb[15].mxu1 }
 0x195   :  { %577 = vst [vmem:[%s1092_s2 + $0x70] sm:$0xff] %v474_v8  ;;  %593 = vst [vmem:[%s1092_s2 + $0xf0] sm:$0xff] %v554_v9 }

</bundles_post_ra>
